<compile_context>
chip_gen: v7x
topology: tpu7x:2x2x1
jax: 0.10.0
libtpu: 0.0.40
codegen_flags: <defaults>
</compile_context>

<pallas_src>
import functools

import jax
import jax.numpy as jnp
from jax.experimental import pallas as pl
from jax.experimental.pallas import tpu as pltpu


def spatial_attention_kernel(x_ref, w1t_ref, w2t_ref, bias_ref, pcl_ref,
                             mask_ref, o_ref, *, inv_l):
    x = x_ref[...]                                   # (Bb, C, Lp), input dtype
    Bb, C, Lp = x.shape
    Crp = w1t_ref.shape[1]                           # padded reduction width
    cdt = pcl_ref.dtype                              # elementwise compute dtype
    xs = x.astype(cdt)                               # elementwise-branch copy

    # ---- channel-context branch: global avg pool + two 1x1 convs (f32) ----
    # Padded lanes of x are zero, so sum * (1/L_true) is the true mean.
    ctx = jnp.sum(x.astype(jnp.float32), axis=-1) * inv_l        # (Bb, C)
    b1 = bias_ref[1:2, 0:Crp]                                    # (1, Crp)
    b2 = bias_ref[0:1, 0:C]                                      # (1, C)
    h = jnp.dot(ctx, w1t_ref[...],
                preferred_element_type=jnp.float32) + b1
    h = jnp.maximum(h, 0.0)                                      # ReLU, (Bb, Crp)
    ctx2 = jnp.dot(h, w2t_ref[...],
                   preferred_element_type=jnp.float32) + b2      # (Bb, C)
    gate = ctx2[:, :, None].astype(cdt)                          # (Bb, C, 1)

    # ---- depthwise conv1d (k=3, padding=1, groups=C) via lane rolls ----
    wdw0 = pcl_ref[:, 0:1]                           # (C, 1)
    wdw1 = pcl_ref[:, 1:2]                           # (C, 1)
    wdw2 = pcl_ref[:, 2:3]                           # (C, 1)
    bdw = pcl_ref[:, 3:4]                            # (C, 1)
    ml = mask_ref[0:1, :]                            # (1, Lp): 0 at column 0
    mr = mask_ref[1:2, :]                            # (1, Lp): 0 at column L-1
    # Fold the boundary masks into the taps once per block: two (C, Lp)
    # multiplies instead of two full (Bb, C, Lp) multiplies.
    w0m = wdw0 * ml                                  # (C, Lp)
    w2m = wdw2 * mr                                  # (C, Lp)
    # roll matches np.roll: out[l] = x[l - shift];  shift=Lp-1 == shift=-1.
    x_lm1 = pltpu.roll(xs, shift=1, axis=2)          # x[..., l-1] (wrap masked)
    x_lp1 = pltpu.roll(xs, shift=Lp - 1, axis=2)     # x[..., l+1] (wrap masked)
    spatial = w0m * x_lm1 + wdw1 * xs + w2m * x_lp1 + bdw        # (Bb, C, Lp)

    # ---- attention gate + apply ----
    attention = jax.nn.sigmoid(gate + spatial)
    o_ref[...] = (xs * attention).astype(o_ref.dtype)


def _tpu_generation():
    """Best-effort TPU generation from the device kind string."""
    try:
        kind = jax.devices()[0].device_kind.lower()
    except Exception:
        return 6
    for g in (7, 6, 5, 4, 3):
        if f"v{g}" in kind:
            return g
    return 6


def _pick_block_batch(B, C, Lp, in_itemsize, compute_itemsize, num_cores,
                      vmem_budget_bytes):
    """Largest batch-block fitting the VMEM budget.

    Counts double-buffered input + output blocks plus ~4 block-sized
    compute-dtype temporaries (casted x, two rolls, spatial/attention).
    On 2-TC chips (v7x) prefers an even number of grid steps for balance;
    on single-TC chips one big block is best.
    """
    per_b = (4 * in_itemsize + 4 * compute_itemsize) * C * Lp
    max_bb = max(1, vmem_budget_bytes // per_b)
    divisors = [d for d in range(1, B + 1) if B % d == 0]
    candidates = [d for d in divisors if d <= max_bb] or [1]
    if num_cores > 1 and B >= num_cores:
        even_steps = [d for d in candidates if (B // d) % num_cores == 0]
        if even_steps:
            return max(even_steps)
        multi_steps = [d for d in candidates if (B // d) >= num_cores]
        if multi_steps:
            return max(multi_steps)
    return max(candidates)


def spatial_attention(x, params, *, block_b=None):
    B, C, L = x.shape
    Cr = params["w1"].shape[0]
    gen = _tpu_generation()
    num_cores = 2 if gen >= 7 else 1

    # Elementwise branch dtype: bf16 only where the VPU/EUP support it.
    if x.dtype == jnp.bfloat16 and gen >= 6:
        compute_dtype = jnp.bfloat16
    else:
        compute_dtype = jnp.float32

    # Lane-dense last dim: pad L up to a multiple of 128 (zero padding).
    Lp = max(128, ((L + 127) // 128) * 128)
    if Lp != L:
        x_in = jnp.pad(x, ((0, 0), (0, 0), (0, Lp - L)))
    else:
        x_in = x

    # Pre-transposed 1x1-conv weights, with Cr zero-padded to a lane-dense
    # width so the context GEMMs avoid partial-lane layouts.
    Crp = max(128, ((Cr + 127) // 128) * 128)
    w1t = jnp.zeros((C, Crp), jnp.float32).at[:, :Cr].set(
        params["w1"].T.astype(jnp.float32))                        # (C, Crp)
    w2t = jnp.zeros((Crp, C), jnp.float32).at[:Cr, :].set(
        params["w2"].T.astype(jnp.float32))                        # (Crp, C)
    # Packed biases: row 0 = b2 (width C), row 1 = b1 (width Crp), zero padded.
    W = max(C, Crp)
    biases = jnp.zeros((2, W), jnp.float32)
    biases = biases.at[0, :C].set(params["b2"].reshape(-1).astype(jnp.float32))
    biases = biases.at[1, :Cr].set(params["b1"].reshape(-1).astype(jnp.float32))
    # Packed per-channel depthwise params: [w0, w1, w2, b], elementwise dtype.
    pcl = jnp.concatenate(
        [params["wdw"].astype(jnp.float32),
         params["bdw"].reshape(C, 1).astype(jnp.float32)],
        axis=1).astype(compute_dtype)                              # (C, 4)
    # Boundary masks for zero padding of the k=3 stencil (true boundaries).
    lane = jnp.arange(Lp)
    masks = jnp.stack([(lane > 0), (lane != (L - 1))]).astype(compute_dtype)

    in_itemsize = jnp.dtype(x.dtype).itemsize
    cmp_itemsize = jnp.dtype(compute_dtype).itemsize
    vmem_budget = (10 << 20) if gen >= 7 else (20 << 20)
    Bb = block_b or _pick_block_batch(B, C, Lp, in_itemsize, cmp_itemsize,
                                      num_cores, vmem_budget)
    assert B % Bb == 0, f"block_b={Bb} must divide batch {B}"
    grid = (B // Bb,)

    # VMEM limit: double-buffered input + output blocks, ~4 compute-dtype
    # block temporaries, plus double-buffered parameter slabs. Cap at 32 MiB
    # on v7x (64 MiB physical VMEM) and 64 MiB on v5e/v6e (128 MiB physical).
    block_bytes = (4 * in_itemsize + 4 * cmp_itemsize) * Bb * C * Lp
    param_bytes = 2 * (w1t.size * 4 + w2t.size * 4 + biases.size * 4
                       + pcl.size * cmp_itemsize + masks.size * cmp_itemsize)
    cap = (32 << 20) if gen >= 7 else (64 << 20)
    vmem_limit = int(min(max(int(1.25 * (block_bytes + param_bytes)),
                             16 << 20), cap))

    kernel = functools.partial(spatial_attention_kernel, inv_l=1.0 / float(L))

    out = pl.pallas_call(
        kernel,
        out_shape=jax.ShapeDtypeStruct((B, C, Lp), x.dtype),
        grid_spec=pltpu.PrefetchScalarGridSpec(
            num_scalar_prefetch=0,
            grid=grid,
            in_specs=[
                pl.BlockSpec((Bb, C, Lp), lambda b: (b, 0, 0)),  # x
                pl.BlockSpec((C, Crp), lambda b: (0, 0)),        # conv1 W^T (padded)
                pl.BlockSpec((Crp, C), lambda b: (0, 0)),        # conv2 W^T (padded)
                pl.BlockSpec((2, W), lambda b: (0, 0)),          # packed biases
                pl.BlockSpec((C, 4), lambda b: (0, 0)),          # packed dw params
                pl.BlockSpec((2, Lp), lambda b: (0, 0)),         # boundary masks
            ],
            out_specs=pl.BlockSpec((Bb, C, Lp), lambda b: (b, 0, 0)),
        ),
        compiler_params=pltpu.CompilerParams(
            dimension_semantics=("parallel",),
            vmem_limit_bytes=vmem_limit),
    )(x_in, w1t, w2t, biases, pcl, masks)

    if Lp != L:
        out = out[:, :, :L]
    return out


def reference(x, params):
    # Pure-JAX reference mirroring the PyTorch forward.
    ctx = jnp.mean(x, axis=-1, keepdims=True)                          # (B,C,1)
    h = jax.nn.relu(jnp.einsum('oc,bcl->bol', params["w1"], ctx)
                    + params["b1"][None])                              # (B,Cr,1)
    ctx2 = (jnp.einsum('oc,bcl->bol', params["w2"], h)
            + params["b2"][None])                                      # (B,C,1)
    xp = jnp.pad(x, ((0, 0), (0, 0), (1, 1)))
    spatial = (params["wdw"][:, 0][None, :, None] * xp[:, :, :-2]
               + params["wdw"][:, 1][None, :, None] * xp[:, :, 1:-1]
               + params["wdw"][:, 2][None, :, None] * xp[:, :, 2:]
               + params["bdw"][None])                                  # (B,C,L)
    return x * jax.nn.sigmoid(ctx2 + spatial)


def init_params(key, channels, reduction_ratio=8):
    Cr = channels // reduction_ratio
    k1, k2, k3, k4, k5, k6 = jax.random.split(key, 6)
    scale = 0.1
    return {
        # nn.Conv1d(channels, channels//r, 1): weight (Cr, C, 1) -> (Cr, C)
        "w1": scale * jax.random.normal(k1, (Cr, channels), jnp.float32),
        "b1": scale * jax.random.normal(k2, (Cr, 1), jnp.float32),
        # nn.Conv1d(channels//r, channels, 1): weight (C, Cr, 1) -> (C, Cr)
        "w2": scale * jax.random.normal(k3, (channels, Cr), jnp.float32),
        "b2": scale * jax.random.normal(k4, (channels, 1), jnp.float32),
        # nn.Conv1d(C, C, 3, padding=1, groups=C): weight (C, 1, 3) -> (C, 3)
        "wdw": scale * jax.random.normal(k5, (channels, 3), jnp.float32),
        "bdw": scale * jax.random.normal(k6, (channels, 1), jnp.float32),
    }


if __name__ == "__main__":
    B, C, L = 2, 32, 128        # batch, channels, sequence length
    key = jax.random.PRNGKey(0)
    kx, kp = jax.random.split(key)
    x = jax.random.normal(kx, (B, C, L), jnp.float32)
    params = init_params(kp, C, reduction_ratio=8)

    out = jax.block_until_ready(spatial_attention(x, params))
    ref = jax.block_until_ready(reference(x, params))

    assert out.shape == (B, C, L)
    err = jnp.max(jnp.abs(out - ref))
    assert jnp.allclose(out, ref, atol=1e-5, rtol=1e-5), f"max abs err {err}"
    print("KERNEL_OK")
</pallas_src>

<mosaic_0001>
module attributes {stable_mosaic.version = 11 : i64} {
  func.func @spatial_attention_kernel(%arg0: i32, %arg1: memref<2x32x128xf32, #tpu.memory_space<vmem>>, %arg2: memref<32x128xf32, #tpu.memory_space<vmem>>, %arg3: memref<128x32xf32, #tpu.memory_space<vmem>>, %arg4: memref<2x128xf32, #tpu.memory_space<vmem>>, %arg5: memref<32x4xf32, #tpu.memory_space<vmem>>, %arg6: memref<2x128xf32, #tpu.memory_space<vmem>>, %arg7: memref<2x32x128xf32, #tpu.memory_space<vmem>>) attributes {dimension_semantics = [#tpu.dimension_semantics<parallel>], iteration_bounds = array<i64: 1>, scalar_prefetch = 0 : i64, scratch_operands = 0 : i64, tpu.core_type = #tpu.core_type<tc>, window_params = [{transform_indices = @transform_0, window_bounds = array<i64: 2, 32, 128>}, {pipeline_mode = #tpu.pipeline_mode<synchronous>, transform_indices = @transform_1, window_bounds = array<i64: 32, 128>}, {pipeline_mode = #tpu.pipeline_mode<synchronous>, transform_indices = @transform_2, window_bounds = array<i64: 128, 32>}, {pipeline_mode = #tpu.pipeline_mode<synchronous>, transform_indices = @transform_3, window_bounds = array<i64: 2, 128>}, {pipeline_mode = #tpu.pipeline_mode<synchronous>, transform_indices = @transform_4, window_bounds = array<i64: 32, 4>}, {pipeline_mode = #tpu.pipeline_mode<synchronous>, transform_indices = @transform_5, window_bounds = array<i64: 2, 128>}, {transform_indices = @transform_6, window_bounds = array<i64: 2, 32, 128>}]} {
    %c0 = arith.constant 0 : index
    %c0_0 = arith.constant 0 : index
    %c0_1 = arith.constant 0 : index
    %0 = vector.load %arg1[%c0, %c0_0, %c0_1] : memref<2x32x128xf32, #tpu.memory_space<vmem>>, vector<2x32x128xf32>
    %cst = arith.constant dense<0.000000e+00> : vector<2x32xf32>
    %1 = vector.multi_reduction <add>, %0, %cst [2] : vector<2x32x128xf32> to vector<2x32xf32>
    %cst_2 = arith.constant 7.812500e-03 : f32
    %2 = vector.broadcast %cst_2 : f32 to vector<2x32xf32>
    %3 = arith.mulf %1, %2 : vector<2x32xf32>
    %c1 = arith.constant 1 : index
    %c0_3 = arith.constant 0 : index
    %4 = vector.load %arg4[%c1, %c0_3] : memref<2x128xf32, #tpu.memory_space<vmem>>, vector<1x128xf32>
    %c0_4 = arith.constant 0 : index
    %c0_5 = arith.constant 0 : index
    %5 = vector.load %arg4[%c0_4, %c0_5] : memref<2x128xf32, #tpu.memory_space<vmem>>, vector<1x32xf32>
    %c0_6 = arith.constant 0 : index
    %c0_7 = arith.constant 0 : index
    %6 = vector.load %arg2[%c0_6, %c0_7] : memref<32x128xf32, #tpu.memory_space<vmem>>, vector<32x128xf32>
    %cst_8 = arith.constant dense<0.000000e+00> : vector<2x128xf32>
    %7 = tpu.matmul %3, %6, %cst_8 {dimension_numbers = #tpu.dot_dimension_numbers<[1], [0], [0], [1], [0, 0, 1, 1], [], []>} : vector<2x32xf32>, vector<32x128xf32>, vector<2x128xf32> -> vector<2x128xf32>
    %8 = vector.broadcast %4 : vector<1x128xf32> to vector<2x128xf32>
    %9 = arith.addf %7, %8 : vector<2x128xf32>
    %cst_9 = arith.constant 0.000000e+00 : f32
    %10 = vector.broadcast %cst_9 : f32 to vector<2x128xf32>
    %11 = arith.maximumf %9, %10 : vector<2x128xf32>
    %c0_10 = arith.constant 0 : index
    %c0_11 = arith.constant 0 : index
    %12 = vector.load %arg3[%c0_10, %c0_11] : memref<128x32xf32, #tpu.memory_space<vmem>>, vector<128x32xf32>
    %cst_12 = arith.constant dense<0.000000e+00> : vector<2x32xf32>
    %13 = tpu.matmul %11, %12, %cst_12 {dimension_numbers = #tpu.dot_dimension_numbers<[1], [0], [0], [1], [0, 0, 1, 1], [], []>} : vector<2x128xf32>, vector<128x32xf32>, vector<2x32xf32> -> vector<2x32xf32>
    %14 = vector.broadcast %5 : vector<1x32xf32> to vector<2x32xf32>
    %15 = arith.addf %13, %14 : vector<2x32xf32>
    %16 = vector.shape_cast %15 : vector<2x32xf32> to vector<2x32x1xf32>
    %c0_13 = arith.constant 0 : index
    %c0_14 = arith.constant 0 : index
    %17 = vector.load %arg5[%c0_13, %c0_14] : memref<32x4xf32, #tpu.memory_space<vmem>>, vector<32x1xf32>
    %c0_15 = arith.constant 0 : index
    %c1_16 = arith.constant 1 : index
    %18 = vector.load %arg5[%c0_15, %c1_16] : memref<32x4xf32, #tpu.memory_space<vmem>>, vector<32x1xf32>
    %c0_17 = arith.constant 0 : index
    %c2 = arith.constant 2 : index
    %19 = vector.load %arg5[%c0_17, %c2] : memref<32x4xf32, #tpu.memory_space<vmem>>, vector<32x1xf32>
    %c0_18 = arith.constant 0 : index
    %c3 = arith.constant 3 : index
    %20 = vector.load %arg5[%c0_18, %c3] : memref<32x4xf32, #tpu.memory_space<vmem>>, vector<32x1xf32>
    %c0_19 = arith.constant 0 : index
    %c0_20 = arith.constant 0 : index
    %21 = vector.load %arg6[%c0_19, %c0_20] : memref<2x128xf32, #tpu.memory_space<vmem>>, vector<1x128xf32>
    %c1_21 = arith.constant 1 : index
    %c0_22 = arith.constant 0 : index
    %22 = vector.load %arg6[%c1_21, %c0_22] : memref<2x128xf32, #tpu.memory_space<vmem>>, vector<1x128xf32>
    %23 = vector.broadcast %17 : vector<32x1xf32> to vector<32x128xf32>
    %24 = vector.broadcast %21 : vector<1x128xf32> to vector<32x128xf32>
    %25 = arith.mulf %23, %24 : vector<32x128xf32>
    %26 = vector.broadcast %19 : vector<32x1xf32> to vector<32x128xf32>
    %27 = vector.broadcast %22 : vector<1x128xf32> to vector<32x128xf32>
    %28 = arith.mulf %26, %27 : vector<32x128xf32>
    %c1_i32 = arith.constant 1 : i32
    %29 = tpu.dynamic_rotate %0 by %c1_i32 dim 2 : vector<2x32x128xf32>, i32 -> vector<2x32x128xf32>
    %c127_i32 = arith.constant 127 : i32
    %30 = tpu.dynamic_rotate %0 by %c127_i32 dim 2 : vector<2x32x128xf32>, i32 -> vector<2x32x128xf32>
    %31 = vector.shape_cast %25 : vector<32x128xf32> to vector<1x32x128xf32>
    %32 = vector.broadcast %31 : vector<1x32x128xf32> to vector<2x32x128xf32>
    %33 = arith.mulf %32, %29 : vector<2x32x128xf32>
    %34 = vector.shape_cast %18 : vector<32x1xf32> to vector<1x32x1xf32>
    %35 = vector.broadcast %34 : vector<1x32x1xf32> to vector<2x32x128xf32>
    %36 = arith.mulf %35, %0 : vector<2x32x128xf32>
    %37 = arith.addf %33, %36 : vector<2x32x128xf32>
    %38 = vector.shape_cast %28 : vector<32x128xf32> to vector<1x32x128xf32>
    %39 = vector.broadcast %38 : vector<1x32x128xf32> to vector<2x32x128xf32>
    %40 = arith.mulf %39, %30 : vector<2x32x128xf32>
    %41 = arith.addf %37, %40 : vector<2x32x128xf32>
    %42 = vector.shape_cast %20 : vector<32x1xf32> to vector<1x32x1xf32>
    %43 = vector.broadcast %42 : vector<1x32x1xf32> to vector<2x32x128xf32>
    %44 = arith.addf %41, %43 : vector<2x32x128xf32>
    %45 = vector.broadcast %16 : vector<2x32x1xf32> to vector<2x32x128xf32>
    %46 = arith.addf %45, %44 : vector<2x32x128xf32>
    %47 = arith.negf %46 : vector<2x32x128xf32>
    %48 = math.exp %47 : vector<2x32x128xf32>
    %cst_23 = arith.constant 1.000000e+00 : f32
    %49 = vector.broadcast %cst_23 : f32 to vector<2x32x128xf32>
    %50 = arith.addf %49, %48 : vector<2x32x128xf32>
    %51 = arith.divf %49, %50 : vector<2x32x128xf32>
    %52 = arith.mulf %0, %51 : vector<2x32x128xf32>
    %c0_24 = arith.constant 0 : index
    %c0_25 = arith.constant 0 : index
    %c0_26 = arith.constant 0 : index
    %53 = vector.load %arg7[%c0_24, %c0_25, %c0_26] : memref<2x32x128xf32, #tpu.memory_space<vmem>>, vector<2x32x128xf32>
    tpu.vector_store %arg7[%c0_24, %c0_25, %c0_26], %52 {strides = array<i32>} : memref<2x32x128xf32, #tpu.memory_space<vmem>>, vector<2x32x128xf32>,
    return
  }
  func.func @transform_0(%arg0: i32) -> (i32, i32, i32) {
    %c0_i32 = arith.constant 0 : i32
    %c0_i32_0 = arith.constant 0 : i32
    %c0_i32_1 = arith.constant 0 : i32
    return %arg0, %c0_i32, %c0_i32_0 : i32, i32, i32
  }
  func.func @transform_1(%arg0: i32) -> (i32, i32) {
    %c0_i32 = arith.constant 0 : i32
    %c0_i32_0 = arith.constant 0 : i32
    %c0_i32_1 = arith.constant 0 : i32
    return %c0_i32, %c0_i32_0 : i32, i32
  }
  func.func @transform_2(%arg0: i32) -> (i32, i32) {
    %c0_i32 = arith.constant 0 : i32
    %c0_i32_0 = arith.constant 0 : i32
    %c0_i32_1 = arith.constant 0 : i32
    return %c0_i32, %c0_i32_0 : i32, i32
  }
  func.func @transform_3(%arg0: i32) -> (i32, i32) {
    %c0_i32 = arith.constant 0 : i32
    %c0_i32_0 = arith.constant 0 : i32
    %c0_i32_1 = arith.constant 0 : i32
    return %c0_i32, %c0_i32_0 : i32, i32
  }
  func.func @transform_4(%arg0: i32) -> (i32, i32) {
    %c0_i32 = arith.constant 0 : i32
    %c0_i32_0 = arith.constant 0 : i32
    %c0_i32_1 = arith.constant 0 : i32
    return %c0_i32, %c0_i32_0 : i32, i32
  }
  func.func @transform_5(%arg0: i32) -> (i32, i32) {
    %c0_i32 = arith.constant 0 : i32
    %c0_i32_0 = arith.constant 0 : i32
    %c0_i32_1 = arith.constant 0 : i32
    return %c0_i32, %c0_i32_0 : i32, i32
  }
  func.func @transform_6(%arg0: i32) -> (i32, i32, i32) {
    %c0_i32 = arith.constant 0 : i32
    %c0_i32_0 = arith.constant 0 : i32
    %c0_i32_1 = arith.constant 0 : i32
    return %arg0, %c0_i32, %c0_i32_0 : i32, i32, i32
  }
}

</mosaic_0001>

<bundles_post_ra>
// kernel: tpu_custom_call.1
= control target key start
LH: loop header
LB: loop body
LE: loop exit
PB: predicated region body
PF: predicated region fallthrough
CT: control target
= control target key end

     0   :  { %s1022_s0 = inlined_call_operand.vmem [shape: f32[2,32,128], index: 0, kind: input, shape index: {}]   ;;  %s1023_s1 = inlined_call_operand.vmem [shape: f32[32,128], index: 1, kind: input, shape index: {}]   ;;  %s1024_s2 = inlined_call_operand.vmem [shape: f32[128,32], index: 2, kind: input, shape index: {}]   ;;  %s1025_s3 = inlined_call_operand.vmem [shape: f32[2,128], index: 3, kind: input, shape index: {}]   ;;  %s1026_s4 = inlined_call_operand.vmem [shape: f32[32,4], index: 4, kind: input, shape index: {}]   ;;  %s1027_s5 = inlined_call_operand.vmem [shape: f32[2,128], index: 5, kind: input, shape index: {}]   ;;  %s1028_s6 = inlined_call_operand.hbm [shape: f32[2,32,128], index: 6, kind: output, shape index: {}]  }
   0x1   :  { %v819_v0 = vld [vmem:[%s1022_s0 + $0x20] sm:$0xff]  ;;  %v831_v2 = vld [vmem:[%s1022_s0 + $0x28] sm:$0xff] }
   0x2   :  { %v824_v1 = vld [vmem:[%s1022_s0] sm:$0xff]  ;;  %40 = vadd.xlane.f32.xlu1 %v819_v0  ;;  %v836_v3 = vld [vmem:[%s1022_s0 + $0x8] sm:$0xff] }
   0x3   :  { %32 = vadd.xlane.f32.xlu0 %v824_v1 }
   0x4   :  { %11 = vsyncpa [#allocation3], 0  ;;  %v843_v4 = vld [vmem:[%s1022_s0 + $0x30] sm:$0xff]  ;;  %v855_v6 = vld [vmem:[%s1022_s0 + $0x38] sm:$0xff]  ;;  %v769_v11 = vmov 0.0|0.0   ;;  %vm770_vm0 = vmmov 0   ;;  %v74_v37 = vlaneseq }
   0x5   :  { %v848_v5 = vld [vmem:[%s1022_s0 + $0x10] sm:$0xff]  ;;  %v860_v7 = vld [vmem:[%s1022_s0 + $0x18] sm:$0xff]  ;;  %v58_v8 = vld [vmem:[%s1023_s1] sm:$0xff]  ;;  %663 = vmatprep.subr.bf16.mxu0 %v769_v11  ;;  %669 = vmatprep.subr.bf16.mxu1 %v769_v11  ;;  %v771_v15 = vmov 0.0   ;;  %vm85_vm1 = vcmask 130112   ;;  %vm92_vm2 = vcmask 195712  }
   0x6   :  { %42 = vadd.xlane.f32.xlu1 %v831_v2  ;;  %v59_v9 = vld [vmem:[%s1023_s1 + $0x8] sm:$0xff]  ;;  %v60_v12 = vld [vmem:[%s1023_s1 + $0x10] sm:$0xff]  ;;  %v61_v13 = vld [vmem:[%s1023_s1 + $0x18] sm:$0xff]  ;;  %625 = vmatprep.mubr.msk.f32.mxu0 %vm770_vm0, %v771_v15  ;;  %v75_v40 = vand.u32 127, %v74_v37  ;;  %v918_v42 = vshrl.u32 %v74_v37, 7  ;;  %vm99_vm3 = vcmask 261312  }
   0x7   :  { %34 = vadd.xlane.f32.xlu0 %v836_v3  ;;  %v664_v10 = vpack.c.bf16 %v59_v9, %v58_v8  ;;  %v667_v14 = vpack.c.bf16 %v61_v13, %v60_v12  ;;  %660 = vmatprep.mubr.msk.f32.mxu1 %vm770_vm0, %v771_v15  ;;  %v196_v16 = vld [vmem:[%s1024_s2] sm:$0xff]  ;;  %v197_v17 = vld [vmem:[%s1024_s2 + $0x8] sm:$0xff]  ;;  %v198_v18 = vld [vmem:[%s1024_s2 + $0x10] sm:$0xff]  ;;  %vm120_vm4 = vcmask 1041409   ;;  %vm122_vm5 = vcmask 261120   ;;  %s776_s8 = smov 1  }
   0x8   :  { %v670_v19 = vpack.c.bf16 %v197_v17, %v196_v16  ;;  %v199_v20 = vld [vmem:[%s1024_s2 + $0x18] sm:$0xff]  ;;  %v200_v22 = vld [vmem:[%s1024_s2 + $0x20] sm:$0xff]  ;;  %v201_v23 = vld [vmem:[%s1024_s2 + $0x28] sm:$0xff]  ;;  %v80_v41 = vadd.s32 4294967288, %v75_v40  ;;  %v87_v45 = vadd.s32 4294967280, %v75_v40  ;;  %v94_v49 = vadd.s32 4294967272, %v75_v40 }
   0x9   :  { %665 = vmatpush3.bf16.msra.mxu0 %v664_v10  ;;  %v673_v21 = vpack.c.bf16 %v199_v20, %v198_v18  ;;  %v676_v24 = vpack.c.bf16 %v201_v23, %v200_v22  ;;  %v202_v25 = vld [vmem:[%s1024_s2 + $0x30] sm:$0xff]  ;;  %v203_v26 = vld [vmem:[%s1024_s2 + $0x38] sm:$0xff]  ;;  %v204_v28 = vld [vmem:[%s1024_s2 + $0x40] sm:$0xff]  ;;  %v78_v50 = vsub.s32 %v75_v40, %v918_v42 }
   0xa   :  { %44 = vadd.xlane.f32.xlu1 %v843_v4  ;;  %666 = vmatprep.subr.bf16.mxu0 %v769_v11  ;;  %v679_v27 = vpack.c.bf16 %v203_v26, %v202_v25  ;;  %v205_v29 = vld [vmem:[%s1024_s2 + $0x48] sm:$0xff]  ;;  %v206_v31 = vld [vmem:[%s1024_s2 + $0x50] sm:$0xff]  ;;  %v207_v32 = vld [vmem:[%s1024_s2 + $0x58] sm:$0xff]  ;;  %v83_v46 = vsub.s32 %v80_v41, %v918_v42  ;;  %v90_v51 = vsub.s32 %v87_v45, %v918_v42  ;;  %v772_v26 = vmov 0  }
   0xb   :  { %36 = vadd.xlane.f32.xlu0 %v848_v5  ;;  %671 = vmatpush3.bf16.msra.mxu1 %v670_v19  ;;  %v682_v30 = vpack.c.bf16 %v205_v29, %v204_v28  ;;  %v685_v33 = vpack.c.bf16 %v207_v32, %v206_v31  ;;  %v208_v34 = vld [vmem:[%s1024_s2 + $0x60] sm:$0xff]  ;;  %v209_v35 = vld [vmem:[%s1024_s2 + $0x68] sm:$0xff]  ;;  %v97_v60 = vsub.s32 %v94_v49, %v918_v42  ;;  %v210_v22 = vld [vmem:[%s1024_s2 + $0x70] sm:$0xff]  ;;  %v773_v29 = vmov 2  }
   0xc   :  { %672 = vmatprep.subr.bf16.mxu1 %v769_v11  ;;  %v688_v36 = vpack.c.bf16 %v209_v35, %v208_v34  ;;  %v211_v23 = vld [vmem:[%s1024_s2 + $0x78] sm:$0xff]  ;;  %v324_v25 = vld [vmem:[%s1026_s4] sm:$0xff]  ;;  %705 = vset.pattern.permute.xlu1 %v772_v26  ;;  %v326_v28 = vld [vmem:[%s1026_s4 + $0x10] sm:$0xff]  ;;  %v774_v31 = vmov 1   ;;  %v775_v32 = vmov 3   ;;  %v307_v45 = vsub.s32 1, %v918_v42 }
   0xd   :  { %668 = vmatpush3.bf16.msra.mxu0 %v667_v14  ;;  %706 = vset.pattern.permute.xlu0 %v772_v26 }
   0xe   :  { %46 = vadd.xlane.f32.xlu1 %v855_v6 }
   0xf   :  { %38 = vadd.xlane.f32.xlu0 %v860_v7  ;;  %674 = vmatpush3.bf16.msra.mxu1 %v673_v21 }
  0x10   :  { %675 = vmatprep.subr.bf16.mxu1 %v769_v11 }
  0x13   :  { %677 = vmatpush3.bf16.msra.mxu1 %v676_v24  ;;  %v691_v24 = vpack.c.bf16 %v211_v23, %v210_v22 }
  0x14   :  { %678 = vmatprep.subr.bf16.mxu1 %v769_v11 }
  0x17   :  { %680 = vmatpush3.bf16.msra.mxu1 %v679_v27  ;;  %v325_v27 = vld [vmem:[%s1026_s4 + $0x8] sm:$0xff] }
  0x18   :  { %681 = vmatprep.subr.bf16.mxu1 %v769_v11 }
  0x1b   :  { %683 = vmatpush3.bf16.msra.mxu1 %v682_v30  ;;  %v327_v30 = vld [vmem:[%s1026_s4 + $0x18] sm:$0xff]  ;;  %s777_s4 = smov 127  }
  0x1c   :  { %684 = vmatprep.subr.bf16.mxu1 %v769_v11 }
  0x1f   :  { %686 = vmatpush3.bf16.msra.mxu1 %v685_v33  ;;  %332 = vperm.xlu1 %705, %v324_v25   ;;  %v582_v33 = vld [vmem:[%s1025_s3 + $0x1] ss:$0 sm:$0xff] }
  0x20   :  { %687 = vmatprep.subr.bf16.mxu1 %v769_v11 }
  0x23   :  { %689 = vmatpush3.bf16.msra.mxu1 %v688_v36  ;;  %342 = vperm.xlu1 %705, %v326_v28  }
  0x24   :  { %690 = vmatprep.subr.bf16.mxu1 %v769_v11 }
  0x25   :  { %337 = vperm.xlu0 %706, %v325_v27  }
  0x27   :  { %692 = vmatpush3.bf16.msra.mxu1 %v691_v24  ;;  %347 = vperm.xlu1 %705, %v327_v30  }
  0x29   :  { %707 = vset.pattern.permute.xlu0 %v773_v29 }
  0x2a   :  { %359 = vperm.xlu0 %707, %v324_v25  }
  0x2b   :  { %708 = vset.pattern.permute.xlu1 %v773_v29 }
  0x2c   :  { %363 = vperm.xlu1 %708, %v325_v27  }
  0x2e   :  { %371 = vperm.xlu0 %707, %v327_v30  }
  0x30   :  { %367 = vperm.xlu1 %708, %v326_v28  }
  0x32   :  { %710 = vset.pattern.permute.xlu0 %v774_v31 }
  0x33   :  { %427 = vperm.xlu0 %710, %v325_v27  }
  0x34   :  { %709 = vset.pattern.permute.xlu1 %v774_v31 }
  0x35   :  { %423 = vperm.xlu1 %709, %v324_v25  }
  0x37   :  { %711 = vset.pattern.permute.xlu0 %v775_v32 }
  0x38   :  { %471 = vperm.xlu0 %711, %v324_v25  }
  0x39   :  { %431 = vperm.xlu1 %709, %v326_v28  }
  0x3c   :  { %483 = vperm.xlu0 %711, %v327_v30  }
  0x3d   :  { %435 = vperm.xlu1 %709, %v327_v30  }
  0x40   :  { %384 = vrot.lane.b32.xlu0 %v836_v3, %s776_s8 }
  0x41   :  { %712 = vset.pattern.permute.xlu1 %v775_v32 }
  0x42   :  { %475 = vperm.xlu1 %712, %v325_v27  }
  0x44   :  { %388 = vrot.lane.b32.xlu0 %v860_v7, %s776_s8 }
  0x46   :  { %479 = vperm.xlu1 %712, %v326_v28  }
  0x48   :  { %392 = vrot.lane.b32.xlu0 %v831_v2, %s776_s8 }
  0x4a   :  { %382 = vrot.lane.b32.xlu1 %v824_v1, %s776_s8 }
  0x4c   :  { %396 = vrot.lane.b32.xlu0 %v855_v6, %s776_s8 }
  0x4e   :  { %386 = vrot.lane.b32.xlu1 %v848_v5, %s776_s8 }
  0x50   :  { %400 = vrot.lane.b32.xlu0 %v836_v3, %s777_s4 }
  0x52   :  { %390 = vrot.lane.b32.xlu1 %v819_v0, %s776_s8 }
  0x54   :  { %404 = vrot.lane.b32.xlu0 %v860_v7, %s777_s4 }
  0x56   :  { %394 = vrot.lane.b32.xlu1 %v843_v4, %s776_s8 }
  0x58   :  { %408 = vrot.lane.b32.xlu0 %v831_v2, %s777_s4 }
  0x5a   :  { %398 = vrot.lane.b32.xlu1 %v824_v1, %s777_s4 }
  0x5c   :  { %412 = vrot.lane.b32.xlu0 %v855_v6, %s777_s4 }
  0x5e   :  { %402 = vrot.lane.b32.xlu1 %v848_v5, %s777_s4 }
  0x62   :  { %406 = vrot.lane.b32.xlu1 %v819_v0, %s777_s4 }
  0x66   :  { %410 = vrot.lane.b32.xlu1 %v843_v4, %s777_s4 }
  0x8f   :  { %v41_v38 = vpop.xlane.xlu1 %40 }
  0x90   :  { %v33_v39 = vpop.xlane.xlu0 %32  ;;  %v52_v54 = vmul.f32 0.0078125, %v41_v38  ;;  %v584_v38 = vld [vmem:[%s1025_s3] ss:$0 sm:$0xff] }
  0x91   :  { %v48_v55 = vmul.f32 0.0078125, %v33_v39  ;;  %v288_v39 = vsub.s32 0, %v918_v42 }
  0x92   :  { %v104_v9 = vrot.slane %v52_v54, %v78_v50 }
  0x93   :  { %v43_v43 = vpop.xlane.xlu1 %42  ;;  %v79_v10 = vrot.slane %v48_v55, %v78_v50 }
  0x94   :  { %v35_v44 = vpop.xlane.xlu0 %34  ;;  %v53_v47 = vmul.f32 0.0078125, %v43_v43 }
  0x95   :  { %v49_v48 = vmul.f32 0.0078125, %v35_v44 }
  0x96   :  { %v108_v58 = vrot.slane %v53_v47, %v83_v46 }
  0x97   :  { %v45_v52 = vpop.xlane.xlu1 %44  ;;  %v84_v59 = vrot.slane %v49_v48, %v83_v46 }
  0x98   :  { %v37_v53 = vpop.xlane.xlu0 %36  ;;  %v54_v56 = vmul.f32 0.0078125, %v45_v52  ;;  %v109_v13 = vsel %vm85_vm1, %v108_v58, %v104_v9 }
  0x99   :  { %v50_v57 = vmul.f32 0.0078125, %v37_v53  ;;  %v86_v14 = vsel %vm85_vm1, %v84_v59, %v79_v10 }
  0x9a   :  { %v113_v61 = vrot.slane %v54_v56, %v90_v51 }
  0x9b   :  { %v91_v62 = vrot.slane %v50_v57, %v90_v51  ;;  %v47_v63 = vpop.xlane.xlu1 %46 }
  0x9c   :  { %v39_v8 = vpop.xlane.xlu0 %38  ;;  %v55_v11 = vmul.f32 0.0078125, %v47_v63  ;;  %v114_v17 = vsel %vm92_vm2, %v113_v61, %v109_v13 }
  0x9d   :  { %v51_v12 = vmul.f32 0.0078125, %v39_v8  ;;  %v93_v18 = vsel %vm92_vm2, %v91_v62, %v86_v14 }
  0x9e   :  { %v118_v15 = vrot.slane %v55_v11, %v97_v60 }
  0x9f   :  { %v98_v16 = vrot.slane %v51_v12, %v97_v60  ;;  %v333_v47 = vpop.permute.xlu1 %332 }
  0xa0   :  { %v119_v20 = vsel %vm99_vm3, %v118_v15, %v114_v17 }
  0xa1   :  { %v100_v19 = vsel %vm99_vm3, %v98_v16, %v93_v18  ;;  %v585_v16 = vld [vmem:[%s1027_s5] ss:$0 sm:$0xff] }
  0xa2   :  { %v121_v21 = vsel %vm120_vm4, %v119_v20, %v100_v19  ;;  %v354_v17 = vmul.f32 %v585_v16, %v333_v47  ;;  %v586_v20 = vld [vmem:[%s1027_s5 + $0x1] ss:$0 sm:$0xff]  ;;  %s778_s5 = smov [#allocation2]  }
  0xa3   :  { %626 = vmatmul.mubr.msk.f32.vlgmr.msra.gmra.mrb[0].mxu0 %vm122_vm5, %v121_v21  ;;  %v343_v48 = vpop.permute.xlu1 %342  ;;  %s571_s16 = sshll.u32 %s778_s5, 4  ;;  %s572_s16 = int_to_ptr.vmem [resolvable:$true] %s571_s16 }
  0xa4   :  { %v338_v52 = vpop.permute.xlu0 %337  ;;  %v356_v22 = vmul.f32 %v585_v16, %v343_v48  ;;  %s745_s0 = scalar_lea.vmem %s572_s16, 1024  ;;  %p750_p1 = scmp.lt.s32.totalorder %s572_s16, %s572_s16 }
  0xa5   :  { %v355_v18 = vmul.f32 %v585_v16, %v338_v52  ;;  %p746_p0 = scmp.ne.s32.totalorder %s572_s16, %s745_s0  ;;  %p751_p2 = scmp.lt.s32.totalorder %s745_s0, %s745_s0 }
  0xa7   :  { %v348_v49 = vpop.permute.xlu1 %347  ;;  %p752_p3 = por %p751_p2, %p750_p1 }
  0xa8   :  { %v357_v29 = vmul.f32 %v585_v16, %v348_v49 }
  0xa9   :  { %v360_v54 = vpop.permute.xlu0 %359  ;;  %p753_p4 = pnand %p752_p3, %p746_p0 }
  0xaa   :  { %v378_v25 = vmul.f32 %v586_v20, %v360_v54 }
  0xab   :  { %v364_v50 = vpop.permute.xlu1 %363 }
  0xac   :  { %v379_v23 = vmul.f32 %v586_v20, %v364_v50 }
  0xad   :  { %v372_v56 = vpop.permute.xlu0 %371 }
  0xaf   :  { %v368_v51 = vpop.permute.xlu1 %367 }
  0xb0   :  { %v380_v30 = vmul.f32 %v586_v20, %v368_v51 }
  0xb2   :  { %v428_v57 = vpop.permute.xlu0 %427 }
  0xb3   :  { %v439_v26 = vmul.f32 %v428_v57, %v836_v3 }
  0xb4   :  { %v424_v53 = vpop.permute.xlu1 %423 }
  0xb5   :  { %v438_v24 = vmul.f32 %v424_v53, %v824_v1  ;;  %v442_v32 = vmul.f32 %v424_v53, %v819_v0 }
  0xb7   :  { %v972_v59 = vpop.permute.xlu0 %471 }
  0xb8   :  { %v432_v55 = vpop.permute.xlu1 %431 }
  0xbb   :  { %v976_v61 = vpop.permute.xlu0 %483 }
  0xbc   :  { %v968_v42 = vpop.permute.xlu1 %435 }
  0xbf   :  { %v385_v63 = vpop.permute.xlu0 %384 }
  0xc0   :  { %v415_v28 = vmul.f32 %v385_v63, %v355_v18 }
  0xc1   :  { %v970_v58 = vpop.permute.xlu1 %475 }
  0xc3   :  { %v389_v9 = vpop.permute.xlu0 %388 }
  0xc5   :  { %v974_v60 = vpop.permute.xlu1 %479 }
  0xc7   :  { %v393_v11 = vpop.permute.xlu0 %392 }
  0xc8   :  { %v419_v63 = vmul.f32 %v393_v11, %v355_v18 }
  0xc9   :  { %v383_v62 = vpop.permute.xlu1 %382 }
  0xca   :  { %v414_v27 = vmul.f32 %v383_v62, %v354_v17  ;;  %v443_v62 = vmul.f32 %v428_v57, %v831_v2 }
  0xcb   :  { %v397_v13 = vpop.permute.xlu0 %396 }
  0xcc   :  { %v421_v57 = vmul.f32 %v397_v13, %v357_v29 }
  0xcd   :  { %v387_v8 = vpop.permute.xlu1 %386 }
  0xcf   :  { %v401_v15 = vpop.permute.xlu0 %400 }
  0xd1   :  { %v391_v10 = vpop.permute.xlu1 %390 }
  0xd3   :  { %v405_v21 = vpop.permute.xlu0 %404 }
  0xd5   :  { %v395_v12 = vpop.permute.xlu1 %394 }
  0xd6   :  { %v420_v48 = vmul.f32 %v395_v12, %v356_v22 }
  0xd9   :  { %v399_v14 = vpop.permute.xlu1 %398 }
  0xdd   :  { %v403_v19 = vpop.permute.xlu1 %402 }
  0xde   :  { %v456_v51 = vmul.f32 %v403_v19, %v380_v30  ;;  %v445_v19 = vmul.f32 %v968_v42, %v855_v6 }
  0xe1   :  { %v407_v31 = vpop.permute.xlu1 %406 }
  0xe2   :  { %v458_v52 = vmul.f32 %v407_v31, %v378_v25 }
  0xe5   :  { %v411_v53 = vpop.permute.xlu1 %410 }
 0x176   :  { %v191_v34 = vpop.f32.mrb[0].mxu0 }
 0x177   :  { %v192_v35 = vadd.f32 %v582_v33, %v191_v34  ;;  %v627_v36 = vpop.f32.mrb[1].mxu0  ;;  %v440_v33 = vmul.f32 %v432_v55, %v848_v5  ;;  %v416_v34 = vmul.f32 %v387_v8, %v356_v22 }
 0x178   :  { %v409_v36 = vpop.permute.xlu0 %408 }
 0x179   :  { %v195_v37 = vmax.f32 %v192_v35, 0.0  ;;  %v418_v35 = vmul.f32 %v391_v10, %v354_v17  ;;  %v459_v18 = vmul.f32 %v409_v36, %v379_v23 }
 0x17b   :  { %661 = vmatmul.mubr.f32.vlgmr.msra.gmra.mrb[0].mxu1 %v195_v37  ;;  %v446_v37 = vadd.f32 %v438_v24, %v414_v27  ;;  %v450_v47 = vadd.f32 %v442_v32, %v418_v35 }
 0x17c   :  { %v413_v54 = vpop.permute.xlu0 %412 }
 0x24e   :  { %v282_v40 = vpop.f32.mrb[0].mxu1 }
 0x24f   :  { %v283_v41 = vadd.f32 %v584_v38, %v282_v40  ;;  %v662_v43 = vpop.f32.mrb[1].mxu1  ;;  %v447_v38 = vadd.f32 %v439_v26, %v415_v28  ;;  %v455_v40 = vmul.f32 %v401_v15, %v379_v23  ;;  %v466_v15 = vadd.f32 %v458_v52, %v450_v47 }
 0x250   :  { %v381_v43 = vmul.f32 %v586_v20, %v372_v56  ;;  %v460_v56 = vmul.f32 %v411_v53, %v380_v30  ;;  %v451_v20 = vadd.f32 %v443_v62, %v419_v63 }
 0x251   :  { %v289_v44 = vrot.slane %v283_v41, %v288_v39  ;;  %v308_v46 = vrot.slane %v283_v41, %v307_v45  ;;  %v454_v39 = vmul.f32 %v399_v14, %v378_v25  ;;  %v444_v41 = vmul.f32 %v432_v55, %v843_v4 }
 0x252   :  { %v448_v45 = vadd.f32 %v440_v33, %v416_v34  ;;  %v463_v50 = vadd.f32 %v455_v40, %v447_v38  ;;  %v457_v55 = vmul.f32 %v405_v21, %v381_v43  ;;  %v490_v28 = vadd.f32 %v972_v59, %v466_v15 }
 0x253   :  { %295 = vbcast.lane.b32.xlu1 %v289_v44, 264  ;;  %291 = vbcast.lane.b32.xlu0 %v289_v44, 256  ;;  %v462_v49 = vadd.f32 %v454_v39, %v446_v37  ;;  %v452_v10 = vadd.f32 %v444_v41, %v420_v48  ;;  %v453_v34 = vadd.f32 %v445_v19, %v421_v57 }
 0x254   :  { %v464_v14 = vadd.f32 %v456_v51, %v448_v45  ;;  %v487_v16 = vadd.f32 %v970_v58, %v463_v50  ;;  %v461_v35 = vmul.f32 %v413_v54, %v381_v43 }
 0x255   :  { %v468_v25 = vadd.f32 %v460_v56, %v452_v10 }
 0x256   :  { %v488_v27 = vadd.f32 %v974_v60, %v464_v14  ;;  %v469_v40 = vadd.f32 %v461_v35, %v453_v34 }
 0x257   :  { %299 = vbcast.lane.b32.xlu1 %v289_v44, 272  ;;  %310 = vbcast.lane.b32.xlu0 %v308_v46, 256 }
 0x25b   :  { %303 = vbcast.lane.b32.xlu1 %v289_v44, 280  ;;  %318 = vbcast.lane.b32.xlu0 %v308_v46, 272  ;;  %v441_v44 = vmul.f32 %v968_v42, %v860_v7  ;;  %v467_v42 = vadd.f32 %v459_v18, %v451_v20 }
 0x25d   :  { %v491_v45 = vadd.f32 %v970_v58, %v467_v42 }
 0x25f   :  { %314 = vbcast.lane.b32.xlu1 %v308_v46, 264 }
 0x263   :  { %322 = vbcast.lane.b32.xlu1 %v308_v46, 280  ;;  %v417_v46 = vmul.f32 %v389_v9, %v357_v29  ;;  %v486_v9 = vadd.f32 %v972_v59, %v462_v49  ;;  %v492_v29 = vadd.f32 %v974_v60, %v468_v25  ;;  %v493_v49 = vadd.f32 %v976_v61, %v469_v40 }
 0x265   :  { %v449_v8 = vadd.f32 %v441_v44, %v417_v46 }
 0x267   :  { %v465_v11 = vadd.f32 %v457_v55, %v449_v8 }
 0x269   :  { %v489_v23 = vadd.f32 %v976_v61, %v465_v11 }
 0x2c5   :  { %v296_v12 = vpop.permute.xlu1 %295  ;;  %v292_v17 = vpop.permute.xlu0 %291 }
 0x2c6   :  { %v495_v22 = vadd.f32 %v487_v16, %v296_v12  ;;  %v494_v24 = vadd.f32 %v486_v9, %v292_v17 }
 0x2c8   :  { %v588_v21 = vmul.f32 -1.442695, %v495_v22  ;;  %v587_v26 = vmul.f32 -1.442695, %v494_v24 }
 0x2c9   :  { %v300_v30 = vpop.permute.xlu1 %299  ;;  %v311_v31 = vpop.permute.xlu0 %310 }
 0x2ca   :  { %713 = vpow2.f32 %v588_v21  ;;  %v496_v32 = vadd.f32 %v488_v27, %v300_v30  ;;  %v498_v33 = vadd.f32 %v490_v28, %v311_v31 }
 0x2cb   :  { %715 = vpow2.f32 %v587_v26 }
 0x2cc   :  { %v589_v37 = vmul.f32 -1.442695, %v496_v32  ;;  %v591_v13 = vmul.f32 -1.442695, %v498_v33 }
 0x2cd   :  { %v304_v36 = vpop.permute.xlu1 %303  ;;  %v319_v38 = vpop.permute.xlu0 %318 }
 0x2ce   :  { %717 = vpow2.f32 %v589_v37  ;;  %v497_v39 = vadd.f32 %v489_v23, %v304_v36  ;;  %v500_v59 = vadd.f32 %v492_v29, %v319_v38 }
 0x2cf   :  { %719 = vpow2.f32 %v591_v13 }
 0x2d0   :  { %v590_v41 = vmul.f32 -1.442695, %v497_v39  ;;  %v593_v44 = vmul.f32 -1.442695, %v500_v59 }
 0x2d1   :  { %v315_v46 = vpop.permute.xlu1 %314 }
 0x2d2   :  { %721 = vpow2.f32 %v590_v41  ;;  %v499_v43 = vadd.f32 %v491_v45, %v315_v46 }
 0x2d3   :  { %723 = vpow2.f32 %v593_v44 }
 0x2d4   :  { %v714_v47 = vpop.eup %713  ;;  %v592_v48 = vmul.f32 -1.442695, %v499_v43 }
 0x2d5   :  { %v716_v60 = vpop.eup %715  ;;  %v527_v50 = vadd.f32 1.0, %v714_v47  ;;  %v323_v51 = vpop.permute.xlu1 %322 }
 0x2d6   :  { %v526_v52 = vadd.f32 1.0, %v716_v60  ;;  %725 = vpow2.f32 %v592_v48  ;;  %v501_v53 = vadd.f32 %v493_v49, %v323_v51 }
 0x2d7   :  { %727 = vrcp.f32 %v527_v50 }
 0x2d8   :  { %v718_v54 = vpop.eup %717  ;;  %729 = vrcp.f32 %v526_v52  ;;  %v594_v62 = vmul.f32 -1.442695, %v501_v53 }
 0x2d9   :  { %v720_v63 = vpop.eup %719  ;;  %v528_v58 = vadd.f32 1.0, %v718_v54 }
 0x2da   :  { %v530_v8 = vadd.f32 1.0, %v720_v63  ;;  %731 = vpow2.f32 %v594_v62 }
 0x2db   :  { %733 = vrcp.f32 %v528_v58 }
 0x2dc   :  { %v722_v10 = vpop.eup %721  ;;  %735 = vrcp.f32 %v530_v8 }
 0x2dd   :  { %v724_v55 = vpop.eup %723  ;;  %v529_v56 = vadd.f32 1.0, %v722_v10 }
 0x2de   :  { %v532_v61 = vadd.f32 1.0, %v724_v55 }
 0x2df   :  { %737 = vrcp.f32 %v529_v56 }
 0x2e0   :  { %v726_v14 = vpop.eup %725  ;;  %739 = vrcp.f32 %v532_v61 }
 0x2e1   :  { %v728_v15 = vpop.eup %727  ;;  %v531_v16 = vadd.f32 1.0, %v726_v14 }
 0x2e2   :  { %v730_v9 = vpop.eup %729  ;;  %v551_v12 = vmul.f32 %v728_v15, %v836_v3 }
 0x2e3   :  { %v550_v17 = vmul.f32 %v730_v9, %v824_v1  ;;  %741 = vrcp.f32 %v531_v16 }
 0x2e4   :  { %v732_v19 = vpop.eup %731  ;;  %559 = vst [vmem:[#allocation2 + $0x8] sm:$0xff] %v551_v12 }
 0x2e5   :  { %v734_v20 = vpop.eup %733  ;;  %558 = vst [vmem:[#allocation2] sm:$0xff] %v550_v17  ;;  %v533_v22 = vadd.f32 1.0, %v732_v19 }
 0x2e6   :  { %v736_v24 = vpop.eup %735  ;;  %v552_v57 = vmul.f32 %v734_v20, %v848_v5 }
 0x2e7   :  { %v554_v11 = vmul.f32 %v736_v24, %v819_v0  ;;  %743 = vrcp.f32 %v533_v22 }
 0x2e8   :  { %560 = vst [vmem:[#allocation2 + $0x10] sm:$0xff] %v552_v57 }
 0x2e9   :  { %v738_v18 = vpop.eup %737  ;;  %562 = vst [vmem:[#allocation2 + $0x20] sm:$0xff] %v554_v11 }
 0x2ea   :  { %v740_v25 = vpop.eup %739  ;;  %v553_v3 = vmul.f32 %v738_v18, %v860_v7 }
 0x2eb   :  { %v556_v1 = vmul.f32 %v740_v25, %v843_v4 }
 0x2ec   :  { %561 = vst [vmem:[#allocation2 + $0x18] sm:$0xff] %v553_v3 }
 0x2ed   :  { %v742_v21 = vpop.eup %741  ;;  %564 = vst [vmem:[#allocation2 + $0x30] sm:$0xff] %v556_v1 }
 0x2ee   :  { %v555_v26 = vmul.f32 %v742_v21, %v831_v2 }
 0x2f0   :  { %563 = vst [vmem:[#allocation2 + $0x28] sm:$0xff] %v555_v26 }
 0x2f1   :  { %v744_v5 = vpop.eup %743 }
 0x2f2   :  { %v557_v0 = vmul.f32 %v744_v5, %v855_v6 }
 0x2f4   :  { %565 = vst [vmem:[#allocation2 + $0x38] sm:$0xff] %v557_v0 }
 0x2f5   :  { %756 = shalt.err (!%p753_p4)
}
 0x2f6   :  { %s757_s19 = scalar_lea.hbm %s1028_s6, 1024 }
 0x2f7   :  { %p758_p5 = scmp.ne.s32.totalorder %s1028_s6, %s757_s19  ;;  %p761_p6 = scmp.lt.u32.totalorder %s757_s19, %s1028_s6 }
 0x2f9   :  { %p763_p7 = pnand %p761_p6, %p758_p5 }
 0x2fb   :  { %766 = shalt.err (!%p763_p7)
}
 0x2fc   :  { %s779_s24 = smov 128   ;;  %s780_s25 = smov 8  }
 0x2fd   :  { %577 = dma.vmem_to_hbm [thread:$0]  %s572_s16, 1024, %s1028_s6, [#allocation3], %s779_s24, %s779_s24, %s780_s25  }
 0x2fe   :  { %767 = dma.done.wait [#allocation3], 1024  }
 0x2ff   :  { %768 = vsyncadd [#allocation3], 4294966272 }
 0x300   :  { %581 = vsyncpa [#allocation3], 1 }

</bundles_post_ra>
